<compile_context>
chip_gen: v6e
topology: v6e:2x2x1
jax: 0.10.0
libtpu: 0.0.40
codegen_flags: <defaults>
</compile_context>

<pallas_src>
import functools

import jax
import jax.numpy as jnp
from jax.experimental import pallas as pl
from jax.experimental.pallas import tpu as pltpu


_NUM_CORE_SPLITS = 2                       # v7x has 2 TCs; ~free on 1-TC chips
_VMEM_WORKING_SET_BUDGET = 12 * 1024 * 1024  # target bytes for buffers + temps
_VMEM_LIMIT_BYTES = 32 * 1024 * 1024         # scoped-VMEM limit (safe on all gens)


def _round_up(x, m):
    return -(-x // m) * m


def _sublane_multiple(dtype):
    return max(8, 32 // jnp.dtype(dtype).itemsize)   # 8 f32 / 16 bf16 / 32 i8


def _bf16_native_ok():
    """bf16 VPU exists on v6e and newer; keep the f32 cast on older chips."""
    try:
        kind = jax.devices()[0].device_kind.lower()
    except Exception:
        return False
    return not any(tag in kind for tag in ("v2", "v3", "v4", "v5"))


def _choose_tile_n(n, c, in_dtype, cast_f32):
    """Largest row tile (dtype-aware sublane multiple) whose lane-padded working
    set (double-buffered logits + labels blocks + in-kernel temporaries) fits the
    VMEM budget."""
    itemsize = jnp.dtype(in_dtype).itemsize
    sub = _sublane_multiple(in_dtype)
    padded_c = _round_up(c, 128)
    compute_itemsize = 4 if cast_f32 else itemsize
    bytes_per_row = (
        2 * padded_c * itemsize        # double-buffered logits input block
        + 2 * 128 * 4                  # double-buffered labels block ([TN,1] -> 128 lanes)
        + padded_c * compute_itemsize  # compute copy of logits (if cast)
        + 3 * padded_c * 4             # col iota / hit matrices / int casts (32-bit wide)
    )
    tile = _VMEM_WORKING_SET_BUDGET // bytes_per_row
    # Don't tile wider than one core-split's share of the (sublane-rounded) batch.
    per_split_rows = _round_up(_round_up(n, _NUM_CORE_SPLITS) // _NUM_CORE_SPLITS, sub)
    tile = min(tile, per_split_rows)
    return max(sub, (tile // sub) * sub)


def _precision_kernel(logits_ref, labels_ref, tp_ref, pc_ref, *,
                      n_rows, tile_n, blocks_per_split, needs_mask, cast_f32):
    split = pl.program_id(0)
    step = pl.program_id(1)

    @pl.when(step == 0)
    def _():
        tp_ref[...] = jnp.zeros_like(tp_ref)
        pc_ref[...] = jnp.zeros_like(pc_ref)

    logits = logits_ref[...]                          # [TN, C]
    if cast_f32 and logits.dtype != jnp.float32:
        logits = logits.astype(jnp.float32)           # only on pre-v6 chips
    labels = labels_ref[...]                          # [TN, 1] int32

    tn, c = logits.shape
    col = jax.lax.broadcasted_iota(jnp.int32, (tn, c), 1)

    # argmax over raw logits, first-index tie-break (torch convention); identical
    # to argmax of the softmax since softmax is monotone.
    # NOTE: all-NaN rows yield pred == c (counted for no class); torch would pick
    # the NaN's index -- degenerate input, accepted divergence.
    row_max = jnp.max(logits, axis=1, keepdims=True)
    pred = jnp.min(jnp.where(logits == row_max, col, c), axis=1, keepdims=True)  # [TN,1]

    if needs_mask:
        # O(TN) ragged / duplicate-block mask: invalid rows get pred == c (out of
        # class range) so they match no class below. Skipped when the grid tiles
        # the batch exactly (static Python check in the wrapper).
        row = jax.lax.broadcasted_iota(jnp.int32, (tn, 1), 0)
        global_row = (split * blocks_per_split + step) * tile_n + row
        pred = jnp.where(global_row < n_rows, pred, c)

    pred_hit = pred == col                            # [TN, C] one-hot prediction
    tp_hit = pred_hit & (labels == col)               # [TN, C]

    # int32 accumulation: exact counting (no 2^24 f32 limit).
    pc_ref[...] += jnp.sum(pred_hit.astype(jnp.int32), axis=0,
                           keepdims=True).reshape(1, 1, c)
    tp_ref[...] += jnp.sum(tp_hit.astype(jnp.int32), axis=0,
                           keepdims=True).reshape(1, 1, c)


def multi_precision(logits, labels, num_classes, average="macro", tile_n=None):
    """Pallas implementation of MultiPrecision.forward (average='macro')."""
    if average != "macro":
        raise NotImplementedError("only average='macro' is implemented")

    n, c = logits.shape
    assert c == num_classes, "logits class dim must equal num_classes"

    labels2 = labels.astype(jnp.int32).reshape(n, 1)   # tiny; no logits copy made

    cast_f32 = (logits.dtype != jnp.float32
                and not (logits.dtype == jnp.bfloat16 and _bf16_native_ok()))

    if tile_n is None:
        tile_n = _choose_tile_n(n, c, logits.dtype, cast_f32)

    total_blocks = pl.cdiv(n, tile_n)
    bpc = pl.cdiv(total_blocks, _NUM_CORE_SPLITS)       # row blocks per core-split
    # Mask only needed when the (split, step) grid over-covers the batch.
    needs_mask = (_NUM_CORE_SPLITS * bpc * tile_n) != n

    def row_block(p, i):
        # Clamp so the (at most one) overhanging block re-reads a valid block
        # instead of DMA-ing out of bounds; its rows are masked in-kernel.
        return (jnp.minimum(p * bpc + i, total_blocks - 1), 0)

    kernel = functools.partial(
        _precision_kernel, n_rows=n, tile_n=tile_n, blocks_per_split=bpc,
        needs_mask=needs_mask, cast_f32=cast_f32)

    tp, pc = pl.pallas_call(
        kernel,
        out_shape=(jax.ShapeDtypeStruct((_NUM_CORE_SPLITS, 1, c), jnp.int32),
                   jax.ShapeDtypeStruct((_NUM_CORE_SPLITS, 1, c), jnp.int32)),
        grid_spec=pltpu.PrefetchScalarGridSpec(
            num_scalar_prefetch=0,
            grid=(_NUM_CORE_SPLITS, bpc),
            in_specs=[
                pl.BlockSpec((tile_n, c), row_block),
                pl.BlockSpec((tile_n, 1), row_block),
            ],
            out_specs=[
                pl.BlockSpec((1, 1, c), lambda p, i: (p, 0, 0)),  # resident tp
                pl.BlockSpec((1, 1, c), lambda p, i: (p, 0, 0)),  # resident pred_count
            ],
        ),
        compiler_params=pltpu.CompilerParams(
            dimension_semantics=("parallel", "arbitrary"),
            vmem_limit_bytes=_VMEM_LIMIT_BYTES),
    )(logits, labels2)

    # Tiny O(C) epilogue in plain JAX: merge per-split partials, fp = pc - tp,
    # per-class precision with 0/0 -> 0, macro mean.
    tp = jnp.sum(tp, axis=(0, 1)).astype(jnp.float32)          # (C,)
    pred_count = jnp.sum(pc, axis=(0, 1)).astype(jnp.float32)  # (C,) == tp + fp
    prec = jnp.where(pred_count > 0.0,
                     tp / jnp.where(pred_count > 0.0, pred_count, 1.0),
                     0.0)
    return jnp.sum(prec) / float(num_classes)


class MultiPrecision:
    """Thin mirror of the PyTorch module."""

    def __init__(self, num_classes: int, average: str = "macro"):
        self.num_classes = num_classes
        self.average = average

    def __call__(self, logits, labels):
        if self.average == "macro":
            return multi_precision(logits, labels, self.num_classes, average="macro")
        elif self.average in ("micro", "weighted"):
            raise NotImplementedError
        else:
            raise ValueError


def _reference(logits, labels, num_classes):
    # Pure-JAX reference mirroring the PyTorch metric.
    pred = jnp.argmax(jax.nn.softmax(logits, axis=1), axis=1)
    classes = jnp.arange(num_classes)
    pred_oh = (pred[:, None] == classes[None, :]).astype(jnp.float32)
    tgt_oh = (labels[:, None] == classes[None, :]).astype(jnp.float32)
    tp = jnp.sum(pred_oh * tgt_oh, axis=0)
    fp = jnp.sum(pred_oh * (1.0 - tgt_oh), axis=0)
    denom = tp + fp
    prec = jnp.where(denom > 0, tp / jnp.where(denom > 0, denom, 1.0), 0.0)
    return jnp.mean(prec)


if __name__ == "__main__":
    num_classes = 4
    batch = 16

    key = jax.random.PRNGKey(0)
    k_logits, k_labels = jax.random.split(key)
    logits = jax.random.normal(k_logits, (batch, num_classes), dtype=jnp.float32)
    labels = jax.random.randint(k_labels, (batch,), 0, num_classes, dtype=jnp.int32)

    metric = MultiPrecision(num_classes, average="macro")
    out = jax.block_until_ready(metric(logits, labels))
    ref = _reference(logits, labels, num_classes)
    assert jnp.allclose(out, ref, atol=1e-6), (out, ref)

    # Ragged batch: exercises the in-kernel row mask + duplicate-block clamping.
    n2 = 37
    logits2 = jax.random.normal(jax.random.PRNGKey(1), (n2, num_classes), jnp.float32)
    labels2 = jax.random.randint(jax.random.PRNGKey(2), (n2,), 0, num_classes, jnp.int32)
    out2 = jax.block_until_ready(multi_precision(logits2, labels2, num_classes, tile_n=8))
    ref2 = _reference(logits2, labels2, num_classes)
    assert jnp.allclose(out2, ref2, atol=1e-6), (out2, ref2)

    # Exactly-tiled batch with several row blocks per core-split (grid (2, 3)).
    n3 = 48
    logits3 = jax.random.normal(jax.random.PRNGKey(3), (n3, num_classes), jnp.float32)
    labels3 = jax.random.randint(jax.random.PRNGKey(4), (n3,), 0, num_classes, jnp.int32)
    out3 = jax.block_until_ready(multi_precision(logits3, labels3, num_classes, tile_n=8))
    ref3 = _reference(logits3, labels3, num_classes)
    assert jnp.allclose(out3, ref3, atol=1e-6), (out3, ref3)

    print("KERNEL_OK")
</pallas_src>

<mosaic_0001>
module attributes {stable_mosaic.version = 11 : i64} {
  func.func @_precision_kernel(%arg0: i32, %arg1: i32, %arg2: memref<8x4xf32, #tpu.memory_space<vmem>>, %arg3: memref<8x1xi32, #tpu.memory_space<vmem>>, %arg4: memref<1x1x4xi32, #tpu.memory_space<vmem>>, %arg5: memref<1x1x4xi32, #tpu.memory_space<vmem>>) attributes {dimension_semantics = [#tpu.dimension_semantics<parallel>, #tpu.dimension_semantics<arbitrary>], iteration_bounds = array<i64: 2, 1>, scalar_prefetch = 0 : i64, scratch_operands = 0 : i64, tpu.core_type = #tpu.core_type<tc>, window_params = [{transform_indices = @transform_0, window_bounds = array<i64: 8, 4>}, {transform_indices = @transform_1, window_bounds = array<i64: 8, 1>}, {transform_indices = @transform_2, window_bounds = array<i64: 1, 1, 4>}, {transform_indices = @transform_3, window_bounds = array<i64: 1, 1, 4>}]} {
    %c0_i32 = arith.constant 0 : i32
    %0 = arith.cmpi eq, %arg1, %c0_i32 : i32
    %1 = arith.extui %0 : i1 to i32
    %c0_i32_0 = arith.constant 0 : i32
    %2 = arith.cmpi ne, %1, %c0_i32_0 : i32
    scf.if %2 {
      %c0_i32_19 = arith.constant 0 : i32
      %33 = vector.broadcast %c0_i32_19 : i32 to vector<1x1x4xi32>
      %c0_20 = arith.constant 0 : index
      %c0_21 = arith.constant 0 : index
      %c0_22 = arith.constant 0 : index
      %34 = vector.load %arg4[%c0_20, %c0_21, %c0_22] : memref<1x1x4xi32, #tpu.memory_space<vmem>>, vector<1x1x4xi32>
      tpu.vector_store %arg4[%c0_20, %c0_21, %c0_22], %33 {strides = array<i32>} : memref<1x1x4xi32, #tpu.memory_space<vmem>>, vector<1x1x4xi32>,
      %c0_i32_23 = arith.constant 0 : i32
      %35 = vector.broadcast %c0_i32_23 : i32 to vector<1x1x4xi32>
      %c0_24 = arith.constant 0 : index
      %c0_25 = arith.constant 0 : index
      %c0_26 = arith.constant 0 : index
      %36 = vector.load %arg5[%c0_24, %c0_25, %c0_26] : memref<1x1x4xi32, #tpu.memory_space<vmem>>, vector<1x1x4xi32>
      tpu.vector_store %arg5[%c0_24, %c0_25, %c0_26], %35 {strides = array<i32>} : memref<1x1x4xi32, #tpu.memory_space<vmem>>, vector<1x1x4xi32>,
    } else {
    }
    %c0 = arith.constant 0 : index
    %c0_1 = arith.constant 0 : index
    %3 = vector.load %arg2[%c0, %c0_1] : memref<8x4xf32, #tpu.memory_space<vmem>>, vector<8x4xf32>
    %c0_2 = arith.constant 0 : index
    %c0_3 = arith.constant 0 : index
    %4 = vector.load %arg3[%c0_2, %c0_3] : memref<8x1xi32, #tpu.memory_space<vmem>>, vector<8x1xi32>
    %5 = tpu.iota {dimensions = array<i32: 1>} : vector<8x4xi32>
    %cst = arith.constant dense<0xFF800000> : vector<8xf32>
    %6 = vector.multi_reduction <maximumf>, %3, %cst [1] : vector<8x4xf32> to vector<8xf32>
    %7 = vector.shape_cast %6 : vector<8xf32> to vector<8x1xf32>
    %8 = vector.broadcast %7 : vector<8x1xf32> to vector<8x4xf32>
    %9 = arith.cmpf oeq, %3, %8 : vector<8x4xf32>
    %c4_i32 = arith.constant 4 : i32
    %10 = vector.broadcast %c4_i32 : i32 to vector<8x4xi32>
    %11 = arith.select %9, %5, %10 : vector<8x4xi1>, vector<8x4xi32>
    %cst_4 = arith.constant dense<2147483647> : vector<8xi32>
    %12 = vector.multi_reduction <minsi>, %11, %cst_4 [1] : vector<8x4xi32> to vector<8xi32>
    %13 = vector.shape_cast %12 : vector<8xi32> to vector<8x1xi32>
    %14 = vector.broadcast %13 : vector<8x1xi32> to vector<8x4xi32>
    %15 = arith.cmpi eq, %14, %5 : vector<8x4xi32>
    %16 = vector.broadcast %4 : vector<8x1xi32> to vector<8x4xi32>
    %17 = arith.cmpi eq, %16, %5 : vector<8x4xi32>
    %18 = arith.andi %15, %17 : vector<8x4xi1>
    %c0_5 = arith.constant 0 : index
    %c0_6 = arith.constant 0 : index
    %c0_7 = arith.constant 0 : index
    %19 = vector.load %arg5[%c0_5, %c0_6, %c0_7] : memref<1x1x4xi32, #tpu.memory_space<vmem>>, vector<1x1x4xi32>
    %20 = arith.extui %15 : vector<8x4xi1> to vector<8x4xi32>
    %cst_8 = arith.constant dense<0> : vector<4xi32>
    %21 = vector.multi_reduction <add>, %20, %cst_8 [0] : vector<8x4xi32> to vector<4xi32>
    %22 = vector.shape_cast %21 : vector<4xi32> to vector<1x4xi32>
    %23 = vector.shape_cast %22 : vector<1x4xi32> to vector<1x1x4xi32>
    %24 = arith.addi %19, %23 : vector<1x1x4xi32>
    %c0_9 = arith.constant 0 : index
    %c0_10 = arith.constant 0 : index
    %c0_11 = arith.constant 0 : index
    %25 = vector.load %arg5[%c0_9, %c0_10, %c0_11] : memref<1x1x4xi32, #tpu.memory_space<vmem>>, vector<1x1x4xi32>
    tpu.vector_store %arg5[%c0_9, %c0_10, %c0_11], %24 {strides = array<i32>} : memref<1x1x4xi32, #tpu.memory_space<vmem>>, vector<1x1x4xi32>,
    %c0_12 = arith.constant 0 : index
    %c0_13 = arith.constant 0 : index
    %c0_14 = arith.constant 0 : index
    %26 = vector.load %arg4[%c0_12, %c0_13, %c0_14] : memref<1x1x4xi32, #tpu.memory_space<vmem>>, vector<1x1x4xi32>
    %27 = arith.extui %18 : vector<8x4xi1> to vector<8x4xi32>
    %cst_15 = arith.constant dense<0> : vector<4xi32>
    %28 = vector.multi_reduction <add>, %27, %cst_15 [0] : vector<8x4xi32> to vector<4xi32>
    %29 = vector.shape_cast %28 : vector<4xi32> to vector<1x4xi32>
    %30 = vector.shape_cast %29 : vector<1x4xi32> to vector<1x1x4xi32>
    %31 = arith.addi %26, %30 : vector<1x1x4xi32>
    %c0_16 = arith.constant 0 : index
    %c0_17 = arith.constant 0 : index
    %c0_18 = arith.constant 0 : index
    %32 = vector.load %arg4[%c0_16, %c0_17, %c0_18] : memref<1x1x4xi32, #tpu.memory_space<vmem>>, vector<1x1x4xi32>
    tpu.vector_store %arg4[%c0_16, %c0_17, %c0_18], %31 {strides = array<i32>} : memref<1x1x4xi32, #tpu.memory_space<vmem>>, vector<1x1x4xi32>,
    return
  }
  func.func @transform_0(%arg0: i32, %arg1: i32) -> (i32, i32) {
    %c1_i32 = arith.constant 1 : i32
    %0 = arith.muli %arg0, %c1_i32 : i32
    %1 = arith.addi %0, %arg1 : i32
    %c1_i32_0 = arith.constant 1 : i32
    %2 = arith.minsi %1, %c1_i32_0 : i32
    %c0_i32 = arith.constant 0 : i32
    %c0_i32_1 = arith.constant 0 : i32
    return %2, %c0_i32 : i32, i32
  }
  func.func @transform_1(%arg0: i32, %arg1: i32) -> (i32, i32) {
    %c1_i32 = arith.constant 1 : i32
    %0 = arith.muli %arg0, %c1_i32 : i32
    %1 = arith.addi %0, %arg1 : i32
    %c1_i32_0 = arith.constant 1 : i32
    %2 = arith.minsi %1, %c1_i32_0 : i32
    %c0_i32 = arith.constant 0 : i32
    %c0_i32_1 = arith.constant 0 : i32
    return %2, %c0_i32 : i32, i32
  }
  func.func @transform_2(%arg0: i32, %arg1: i32) -> (i32, i32, i32) {
    %c0_i32 = arith.constant 0 : i32
    %c0_i32_0 = arith.constant 0 : i32
    %c0_i32_1 = arith.constant 0 : i32
    return %arg0, %c0_i32, %c0_i32_0 : i32, i32, i32
  }
  func.func @transform_3(%arg0: i32, %arg1: i32) -> (i32, i32, i32) {
    %c0_i32 = arith.constant 0 : i32
    %c0_i32_0 = arith.constant 0 : i32
    %c0_i32_1 = arith.constant 0 : i32
    return %arg0, %c0_i32, %c0_i32_0 : i32, i32, i32
  }
}

</mosaic_0001>

<bundles_post_ra>
// kernel: tpu_custom_call.1
= control target key start
LH: loop header
LB: loop body
LE: loop exit
PB: predicated region body
PF: predicated region fallthrough
CT: control target
= control target key end

     0   :  { %9 = vsyncpa [#allocation3], 0  ;;  %s818_s0 = inlined_call_operand.vmem [shape: f32[16,4], index: 0, kind: input, shape index: {}]   ;;  %s819_s1 = inlined_call_operand.vmem [shape: s32[16,1], index: 1, kind: input, shape index: {}]   ;;  %s820_s2 = inlined_call_operand.hbm [shape: s32[2,1,4], index: 2, kind: output, shape index: {0}]   ;;  %s821_s3 = inlined_call_operand.hbm [shape: s32[2,1,4], index: 3, kind: output, shape index: {1}]  }
   0x1   :  { %11 = vsyncpa [#allocation3 + $0x1], 0 }
   0x2   :  { %12 = vsyncpa [#allocation5], 0 }
   0x3   :  { %14 = vsyncpa [#allocation5 + $0x1], 0  ;;  %s651_s12 = smov 0   ;;  %s653_s13 = smov 0  }
   0x4   :  { %s655_s14 = smov 0   ;;  %s657_s15 = smov 0  }
   0x5   :  { %s659_s16 = smov 0   ;;  %s661_s17 = smov 0  }
   0x6 LB: > { %s440_s18 = sadd.s32 4294967295, %s626_s17   ;;  %s441_s19 = sadd.s32 4294967294, %s626_s17   ;;  %s626_s17 = sphi %s661_s17, %s20_s17   ;;  %s622_s16 = sphi %s659_s16, %s828_s16   ;;  %s618_s15 = sphi %s657_s15, %s827_s15   ;;  %s614_s14 = sphi %s655_s14, %s826_s14   ;;  %s610_s13 = sphi %s653_s13, %s825_s13   ;;  %s606_s12 = sphi %s651_s12, %s824_s12  }
   0x7   : > { %s32_s20 = sadd.s32 1, %s622_s16  ;;  %s103_s21 = sadd.s32 1, %s614_s14 }
   0x8   : > { %p34_p0 = scmp.ge.s32.totalorder %s32_s20, 2  ;;  %p113_p1 = scmp.ne.s32.totalorder %s614_s14, %s610_s13 }
   0x9   : > { %p114_p2 = scmp.eq.s32.totalorder %s440_s18, 1  ;;  %p119_p3 = scmp.ne.s32.totalorder %s610_s13, %s606_s12 }
   0xa   : > { %s830_s20 = smov (%p34_p0, %s32_s20), 0  ;;  %p120_p5 = scmp.eq.s32.totalorder %s441_s19, 1 }
   0xb   : > { %p691_p4 = por %p114_p2, %p113_p1  ;;  %s100_s23 = ssub.s32 %s622_s16, %s830_s20 }
   0xc   : > { %p444_p6 = scmp.ge.s32.totalorder %s626_s17, 1  ;;  %p101_p7 = scmp.eq.s32.totalorder %s100_s23, 0 }
   0xd   : > { %p698_p8 = por %p120_p5, %p119_p3  ;;  %p190_p9 = scmp.lt.s32.totalorder %s626_s17, 3 }
   0xe   : > { %s704_s25 = scalar_select %p101_p7, %s614_s14, %s103_s21  }
   0xf   : > { %p191_p10 = pnand %p444_p6, %p190_p9 }
  0x10   : > { %p227_p11 = scmp.lt.s32.totalorder (!%p191_p10), %s618_s15, 1  ;;  %s717_s7 = sand.u32 (!%p191_p10), 1, %s610_s13  }
  0x11   : > { %194 = sbr.rel (%p191_p10) target bundleno = 509 (0x1fd), region = 28  ;;  %s720_s8 = scalar_lea.vmem (!%p191_p10), [#allocation4], %s717_s7 }
  0x12   : > { %s725_s9 = scalar_lea.vmem (!%p191_p10), [#allocation2], %s717_s7  ;;  %s453_s10 = sshll.u32 (!%p191_p10), %s618_s15, 4 }
  0x13   : > { %s337_s11 = sshll.u32 (!%p191_p10), %s720_s8, 4  ;;  %s324_s18 = sshll.u32 (!%p191_p10), %s725_s9, 4  ;;  %s741_s11 = int_to_ptr.vmem [resolvable:$true] %s337_s11  ;;  %s748_s18 = int_to_ptr.vmem [resolvable:$true] %s324_s18 }
  0x14   : > { %s739_s23 = scalar_lea.hbm (!%p191_p10), %s821_s3, %s453_s10  ;;  %s312_s28 = scalar_lea.sflag (!%p191_p10), [#allocation5], %s717_s7 }
  0x15   : > { %s520_s29 = scalar_lea.vmem (!%p191_p10), %s741_s11, 16 }
  0x16   : > { %s228_s26 = scalar_select %p227_p11, %s618_s15, 1  ;;  %vm257_vm0 = vcmask 31744   ;;  %v255_v2 = vlaneseq  ;;  %v628_v9 = vmov 0   ;;  %vm250_vm3 = vcmask 24576  }
  0x17   : > { %518 = vset.pattern.permute.xlu1 %v628_v9  ;;  %519 = vset.pattern.permute.xlu0 %v628_v9  ;;  %252 = vst.msk [vmem:[%s720_s8] sm:$0x1] %vm250_vm3, %v628_v9  ;;  %251 = vst.msk [vmem:[%s725_s9] sm:$0x1] %vm250_vm3, %v628_v9  ;;  %p521_p12 = scmp.ne.s32.totalorder %s741_s11, %s520_s29 }
  0x18   : > { %s832_s26 = smov (!%p227_p11, %s228_s26), 1  ;;  %v256_v3 = vand.u32 127, %v255_v2 }
  0x19   : > { %s448_s27 = sshll.u32 %s832_s26, 3  ;;  %p522_p13 = pnand %p521_p12, %p691_p4 }
  0x1a   : > { %s232_s30 = scalar_lea.vmem %s818_s0, %s448_s27  ;;  %s242_s6 = scalar_lea.vmem %s819_s1, %s448_s27 }
  0x1b   : > { %v253_v0 = vld [vmem:[%s232_s30] sm:$0xff]  ;;  %s746_s27 = scalar_lea.hbm %s820_s2, %s453_s10  ;;  %p523_p0 = pneg %p522_p13 }
  0x1c   : > { %v258_v1 = vsel %vm257_vm0, %v253_v0, -inf  ;;  %v254_v14 = vld [vmem:[%s242_s6] sm:$0xff]  ;;  %s629_s30 = smov [#allocation4]  }
  0x1d   : > { %259 = vmax.xlane.f32.xlu0 %v258_v1  ;;  %s524_s4 = sshll.u32 %s629_s30, 4  ;;  %s525_s4 = int_to_ptr.vmem [resolvable:$false] %s524_s4 }
  0x1e   : > { %v284_v35 = vld [vmem:[%s720_s8] sm:$0x1]  ;;  %s526_s5 = scalar_lea.vmem %s525_s4, 32  ;;  %p527_p1 = scmp.lt.s32.totalorder %s741_s11, %s525_s4 }
  0x1f   : > { %v296_v37 = vld [vmem:[%s725_s9] sm:$0x1]  ;;  %p528_p2 = scmp.lt.s32.totalorder %s526_s5, %s520_s29 }
  0x21   : > { %p529_p3 = por %p528_p2, %p527_p1 }
  0x23   : > { %p530_p5 = pnand %p529_p3, %p523_p0 }
  0xa6   : > { %v260_v4 = vpop.xlane.xlu0 %259 }
  0xa7   : > { %vm261_vm1 = vcmp.eq.f32.partialorder %v253_v0, %v260_v4 }
  0xa8   : > { %v262_v5 = vsel %vm261_vm1, %v256_v3, 4 }
  0xa9   : > { %v263_v6 = vsel %vm257_vm0, %v262_v5, 2147483647 }
  0xaa   : > { %v265_v7 = vshra.s32 %v263_v6, 16  ;;  %v264_v10 = vand.u32 65535, %v263_v6 }
  0xac   : > { %v267_v8 = vcvt.s32.f32 %v265_v7  ;;  %v266_v12 = vcvt.s32.f32 %v264_v10 }
  0xae   : > { %268 = vmin.xlane.f32.xlu0 %v267_v8 }
 0x137   : > { %v269_v11 = vpop.xlane.xlu0 %268 }
 0x138   : > { %vm270_vm2 = vcmp.eq.f32.partialorder %v267_v8, %v269_v11  ;;  %v275_v15 = vcvt.f32.s32 %v269_v11 }
 0x139   : > { %v271_v13 = vsel %vm270_vm2, %v266_v12, inf }
 0x13a   : > { %272 = vmin.xlane.f32.xlu1 %v271_v13  ;;  %v276_v17 = vshll.u32 %v275_v15, 16 }
 0x14b   : > { %280 = vperm.xlu1 %518, %v254_v14  }
 0x1c3   : > { %v273_v16 = vpop.xlane.xlu1 %272 }
 0x1c4   : > { %v274_v18 = vcvt.f32.s32 %v273_v16 }
 0x1c6   : > { %v277_v19 = vadd.s32 %v276_v17, %v274_v18 }
 0x1c7   : > { %v281_v20 = vpop.permute.xlu1 %280 }
 0x1c8   : > { %vm278_vm4 = vcmp.eq.s32.totalorder %v277_v19, %v256_v3  ;;  %vm282_vm5 = vcmp.eq.s32.totalorder %v281_v20, %v256_v3 }
 0x1c9   : > { %v285_v21 = vsel %vm278_vm4, 1, %v628_v9  ;;  %vm283_vm6 = vmand %vm278_vm4, %vm282_vm5 }
 0x1ca   : > { %v286_v22 = vsel %vm257_vm0, %v285_v21, 0  ;;  %v297_v23 = vsel %vm283_vm6, 1, %v628_v9 }
 0x1cb   : > { %v287_v24 = vrot.slane %v286_v22, 4  ;;  %v298_v25 = vsel %vm257_vm0, %v297_v23, 0 }
 0x1cc   : > { %v299_v26 = vrot.slane %v298_v25, 4 }
 0x1cd   : > { %v288_v27 = vadd.s32 %v287_v24, %v286_v22 }
 0x1ce   : > { %v300_v28 = vadd.s32 %v299_v26, %v298_v25 }
 0x1cf   : > { %v289_v29 = vrot.slane %v288_v27, 2 }
 0x1d0   : > { %v301_v30 = vrot.slane %v300_v28, 2 }
 0x1d1   : > { %v290_v31 = vadd.s32 %v289_v29, %v288_v27 }
 0x1d2   : > { %v302_v32 = vadd.s32 %v301_v30, %v300_v28 }
 0x1d3   : > { %v291_v33 = vrot.slane %v290_v31, 1 }
 0x1d4   : > { %v303_v34 = vrot.slane %v302_v32, 1 }
 0x1d5   : > { %v292_v36 = vadd.s32 %v291_v33, %v290_v31 }
 0x1d6   : > { %v304_v38 = vadd.s32 %v303_v34, %v302_v32 }
 0x1d7   : > { %v293_v39 = vadd.s32 %v292_v36, %v284_v35 }
 0x1d8   : > { %v305_v40 = vadd.s32 %v304_v38, %v296_v37 }
 0x1d9   : > { %295 = vst.msk [vmem:[%s720_s8] sm:$0x1] %vm250_vm3, %v293_v39 }
 0x1da   : > { %306 = vst.msk [vmem:[%s725_s9] sm:$0x1] %vm250_vm3, %v305_v40 }
 0x1db   : > { %533 = shalt.err (!%p530_p5)
}
 0x1dc   : > { %s534_s6 = scalar_lea.hbm %s739_s23, 16  ;;  %s538_s10 = scalar_lea.hbm %s821_s3, 32 }
 0x1dd   : > { %p535_p6 = scmp.ne.s32.totalorder %s739_s23, %s534_s6  ;;  %p539_p10 = scmp.lt.s32.totalorder %s739_s23, %s821_s3 }
 0x1de   : > { %p540_p11 = scmp.lt.s32.totalorder %s538_s10, %s534_s6 }
 0x1df   : > { %p536_p7 = pnand %p535_p6, %p691_p4 }
 0x1e0   : > { %p541_p12 = por %p540_p11, %p539_p10 }
 0x1e1   : > { %p537_p9 = pneg %p536_p7 }
 0x1e3   : > { %p542_p13 = pnand %p541_p12, %p537_p9 }
 0x1e5   : > { %545 = shalt.err (!%p542_p13)
}
 0x1e6   : > { %458 = dma.vmem_to_hbm [thread:$0]  (%p691_p4), %s741_s11, 16, %s739_s23, %s312_s28  }
 0x1e7   : > { %s308_s15 = scalar_lea.sflag [#allocation3], %s717_s7  ;;  %s546_s26 = scalar_lea.vmem %s748_s18, 16 }
 0x1e8   : > { %p547_p0 = scmp.ne.s32.totalorder %s748_s18, %s546_s26  ;;  %s630_s29 = smov [#allocation2]  }
 0x1e9   : > { %s550_s30 = sshll.u32 %s630_s29, 4  ;;  %s551_s30 = int_to_ptr.vmem [resolvable:$false] %s550_s30 }
 0x1ea   : > { %p548_p1 = pnand %p547_p0, %p691_p4  ;;  %s552_s4 = scalar_lea.vmem %s551_s30, 32 }
 0x1eb   : > { %p553_p3 = scmp.lt.s32.totalorder %s748_s18, %s551_s30  ;;  %p554_p5 = scmp.lt.s32.totalorder %s552_s4, %s546_s26 }
 0x1ec   : > { %p549_p2 = pneg %p548_p1 }
 0x1ed   : > { %p555_p6 = por %p554_p5, %p553_p3 }
 0x1ef   : > { %p556_p7 = pnand %p555_p6, %p549_p2 }
 0x1f1   : > { %559 = shalt.err (!%p556_p7)
}
 0x1f2   : > { %s560_s11 = scalar_lea.hbm %s746_s27, 16  ;;  %s564_s28 = scalar_lea.hbm %s820_s2, 32 }
 0x1f3   : > { %p561_p9 = scmp.ne.s32.totalorder %s746_s27, %s560_s11  ;;  %p565_p12 = scmp.lt.s32.totalorder %s746_s27, %s820_s2 }
 0x1f4   : > { %p566_p13 = scmp.lt.s32.totalorder %s564_s28, %s560_s11 }
 0x1f5   : > { %p562_p10 = pnand %p561_p9, %p691_p4 }
 0x1f6   : > { %p567_p0 = por %p566_p13, %p565_p12 }
 0x1f7   : > { %p563_p11 = pneg %p562_p10 }
 0x1f9   : > { %p568_p1 = pnand %p567_p0, %p563_p11 }
 0x1fb   : > { %571 = shalt.err (!%p568_p1)
}
 0x1fc   : > { %457 = dma.vmem_to_hbm [thread:$0]  (%p691_p4), %s748_s18, 16, %s746_s27, %s308_s15  }
 0x1fd PF: > { %p468_p2 = scmp.ge.s32.totalorder %s626_s17, 2  ;;  %s349_s8 = sand.u32 1, %s606_s12  }
 0x1fe   : > { %s350_s9 = scalar_lea.sflag [#allocation3], %s349_s8 }
 0x1ff   : > { %p462_p3 = pnand %p468_p2, %p698_p8 }
 0x201   : > { %p463_p5 = pneg %p462_p3 }
 0x203   : > { %597 = dma.done.wait (%p463_p5), %s350_s9, 16  }
 0x204   : > { %599 = vsyncadd (%p463_p5), %s350_s9, 4294967280  ;;  %s358_s10 = scalar_lea.sflag [#allocation5], %s349_s8 }
 0x205   : > { %601 = dma.done.wait (%p463_p5), %s358_s10, 16  }
 0x206   : > { %603 = vsyncadd (%p463_p5), %s358_s10, 4294967280  ;;  %s20_s17 = sadd.s32 1, %s626_s17   ;;  %s824_s12 = smov %s610_s13 }
 0x207   : > { %p17_p6 = scmp.ge.s32.totalorder %s20_s17, 4   ;;  %s825_s13 = smov %s614_s14 }
 0x208   : > { %s826_s14 = smov %s704_s25  ;;  %s827_s15 = smov %s622_s16 }
 0x209   : > { %s828_s16 = smov %s830_s20  ;;  %19 = sbr.rel (!%p17_p6) target bundleno = 6 (0x6), region = 87 }
 0x20e   :  { %362 = vsyncpa [#allocation3], 1 }
 0x20f   :  { %364 = vsyncpa [#allocation3 + $0x1], 1 }
 0x210   :  { %365 = vsyncpa [#allocation5], 1 }
 0x211   :  { %367 = vsyncpa [#allocation5 + $0x1], 1 }

</bundles_post_ra>
